<compile_context>
chip_gen: v5e
topology: v5e:2x2
jax: 0.10.0
libtpu: 0.0.40
codegen_flags: <defaults>
</compile_context>

<pallas_src>
import functools
import math

import jax
import jax.numpy as jnp
from jax import lax
from jax.experimental import pallas as pl
from jax.experimental.pallas import tpu as pltpu


def _pick_tile(n, candidates):
    """Largest candidate tile that divides n, else the full extent."""
    for c in candidates:
        if n % c == 0:
            return c
    # TODO(synk): for large non-aligned M/S, pad to a 128-multiple and mask
    # the kv tail instead of falling back to one full-extent block.
    return n


def _vmem_limit_bytes(estimate):
    """Generous scoped-VMEM limit from an analytic block-size estimate.

    Floor at the 32 MiB scoped default, cap at v7x's 64 MiB physical VMEM so
    the value is valid on v5e / v6e / v7x alike.
    """
    return int(min(max(2 * estimate + (4 << 20), 32 << 20), 64 << 20))


# --------------------------- fused Q/K/V projection ---------------------------

def _qkv_proj_kernel(*refs, shared):
    if shared:
        (x_ref, wq_ref, bq_ref, wk_ref, bk_ref, wv_ref, bv_ref,
         q_ref, k_ref, v_ref) = refs
        xq = xk = xv = x_ref[...]
    else:
        (xq_ref, xk_ref, xv_ref, wq_ref, bq_ref, wk_ref, bk_ref,
         wv_ref, bv_ref, q_ref, k_ref, v_ref) = refs
        xq = xq_ref[...]
        xk = xk_ref[...]
        xv = xv_ref[...]
    q_ref[...] = (jnp.dot(xq, wq_ref[...], preferred_element_type=jnp.float32)
                  + bq_ref[...]).astype(q_ref.dtype)
    k_ref[...] = (jnp.dot(xk, wk_ref[...], preferred_element_type=jnp.float32)
                  + bk_ref[...]).astype(k_ref.dtype)
    v_ref[...] = (jnp.dot(xv, wv_ref[...], preferred_element_type=jnp.float32)
                  + bv_ref[...]).astype(v_ref.dtype)


# --------------------- flash attention + fused out-projection -----------------

def _flash_attn_kernel(q_ref, k_ref, v_ref, wo_ref, bo_ref, o_ref,
                       m_sc, l_sc, acc_sc, *, n_heads, head_dim, tk,
                       kv_resident):
    ki = pl.program_id(2)

    @pl.when(ki == 0)
    def _():
        m_sc[...] = jnp.full_like(m_sc, -jnp.inf)
        l_sc[...] = jnp.zeros_like(l_sc)
        acc_sc[...] = jnp.zeros_like(acc_sc)

    q = q_ref[...]                       # (tq, D) bf16, pre-scaled by 1/sqrt(hd)
    if kv_resident:
        # K/V block is the whole (S, D) sequence, resident per batch; slice the
        # current kv tile out of it (no per-q-tile re-DMA of K/V).
        start = pl.multiple_of(ki * tk, tk)
        k = k_ref[pl.ds(start, tk), :]   # (tk, D)
        v = v_ref[pl.ds(start, tk), :]   # (tk, D)
    else:
        k = k_ref[...]                   # (tk, D)
        v = v_ref[...]                   # (tk, D)

    tq = q.shape[0]

    # Unrolled head loop; heads live in static lane slices of D so no
    # reshape/transpose head split is materialized in VMEM.
    # TODO(synk): for n_heads > 16 unroll in groups (lax.fori_loop over head
    # groups) to bound vreg live ranges and compile time.
    pv_parts = []
    alpha_parts = []
    for h in range(n_heads):
        lo = h * head_dim
        qh = q[:, lo:lo + head_dim]      # (tq, hd)
        kh = k[:, lo:lo + head_dim]      # (tk, hd)
        vh = v[:, lo:lo + head_dim]      # (tk, hd)

        # (tq, hd) x (tk, hd) -> (tq, tk): contract over head_dim on the MXU.
        s = lax.dot_general(qh, kh, (((1,), (1,)), ((), ())),
                            preferred_element_type=jnp.float32)

        m_prev = m_sc[h]                                            # (tq, 1)
        m_new = jnp.maximum(m_prev, jnp.max(s, axis=-1, keepdims=True))
        alpha = jnp.exp(m_prev - m_new)                             # (tq, 1)
        p = jnp.exp(s - m_new)                                      # (tq, tk)
        l_sc[h] = alpha * l_sc[h] + jnp.sum(p, axis=-1, keepdims=True)
        m_sc[h] = m_new

        pv = jnp.dot(p.astype(v.dtype), vh,
                     preferred_element_type=jnp.float32)            # (tq, hd)
        pv_parts.append(pv)
        alpha_parts.append(jnp.broadcast_to(alpha, (tq, head_dim)))

    # One lane-dense full-width accumulator update per kv step (no per-head
    # masked sub-vreg read-modify-write of acc).
    alpha_full = jnp.concatenate(alpha_parts, axis=-1)              # (tq, D)
    pv_full = jnp.concatenate(pv_parts, axis=-1)                    # (tq, D)
    acc_sc[...] = alpha_full * acc_sc[...] + pv_full

    @pl.when(ki == pl.num_programs(2) - 1)
    def _():
        # Lane-dense finalize: per-head EUP reciprocal (approx, ~free) is
        # broadcast/concatenated once, then a single full-width multiply.
        inv_parts = [
            jnp.broadcast_to(pl.reciprocal(l_sc[h], approx=True),
                             (tq, head_dim))
            for h in range(n_heads)
        ]
        inv_full = jnp.concatenate(inv_parts, axis=-1)              # (tq, D)
        ctx = (acc_sc[...] * inv_full).astype(wo_ref.dtype)         # (tq, D)
        # TODO(synk): for very large D (>= ~4096) on v7x, tile the output
        # projection over Wo columns instead of keeping the full (D, D) block
        # resident for the whole kernel.
        out = jnp.dot(ctx, wo_ref[...],
                      preferred_element_type=jnp.float32) + bo_ref[...]
        o_ref[...] = out.astype(o_ref.dtype)


# ------------------------------- wrapper --------------------------------------

def multi_head_attention(query, key, value, params, *, n_heads,
                         compute_dtype=jnp.bfloat16, out_dtype=None,
                         kv_resident=None):
    """query/key/value: [B, S, D]. params hold transposed (in, out) weights.

    out_dtype defaults to query.dtype; pass compute_dtype (bf16) to halve the
    output writeback if the consumer accepts it.
    """
    B, S, D = query.shape
    head_dim = D // n_heads
    assert head_dim * n_heads == D, 'model_dim must be divisible by n_heads'
    scale = 1.0 / math.sqrt(head_dim)
    M = B * S
    cdt = compute_dtype
    if out_dtype is None:
        out_dtype = query.dtype

    # Self-attention: pass (and DMA) the activation only once.
    shared = (query is key) and (key is value)

    # Fold the 1/sqrt(head_dim) score scale into Wq / bq (one-off weight-sized
    # op; removes every per-score / per-activation scale multiply).
    wq = (params['wq_t'] * scale).astype(cdt)
    bq = (params['bq'] * scale).reshape(1, D).astype(jnp.float32)
    wk = params['wk_t'].astype(cdt)
    bk = params['bk'].reshape(1, D).astype(jnp.float32)
    wv = params['wv_t'].astype(cdt)
    bv = params['bv'].reshape(1, D).astype(jnp.float32)
    wo = params['wo_t'].astype(cdt)
    bo = params['bo'].reshape(1, D).astype(jnp.float32)

    # ---- fused Q/K/V projections: grid (row tiles, output-column tiles) ----
    tm = _pick_tile(M, (256, 128))            # 256 keeps v7x comfortable
    tn = _pick_tile(D, (512, 256, 128))       # bounds weight residency per step

    row_spec = pl.BlockSpec((tm, D), lambda i, j: (i, 0))
    w_spec = pl.BlockSpec((D, tn), lambda i, j: (0, j))
    b_spec = pl.BlockSpec((1, tn), lambda i, j: (0, j))
    out_spec = pl.BlockSpec((tm, tn), lambda i, j: (i, j))

    n_x = 1 if shared else 3
    proj_est = (n_x * tm * D * 2 * 2          # activations (bf16, double-buf)
                + 3 * D * tn * 2 * 2          # weight column slabs
                + 3 * 8 * tn * 4 * 2          # biases (sublane-padded, f32)
                + 3 * tm * tn * 2 * 2)        # outputs

    if shared:
        x = query.reshape(M, D).astype(cdt)
        proj_inputs = (x, wq, bq, wk, bk, wv, bv)
        in_specs = [row_spec, w_spec, b_spec, w_spec, b_spec, w_spec, b_spec]
    else:
        xq = query.reshape(M, D).astype(cdt)
        xk = key.reshape(M, D).astype(cdt)
        xv = value.reshape(M, D).astype(cdt)
        proj_inputs = (xq, xk, xv, wq, bq, wk, bk, wv, bv)
        in_specs = [row_spec, row_spec, row_spec,
                    w_spec, b_spec, w_spec, b_spec, w_spec, b_spec]

    q, k, v = pl.pallas_call(
        functools.partial(_qkv_proj_kernel, shared=shared),
        out_shape=(jax.ShapeDtypeStruct((M, D), cdt),
                   jax.ShapeDtypeStruct((M, D), cdt),
                   jax.ShapeDtypeStruct((M, D), cdt)),
        grid=(M // tm, D // tn),
        in_specs=in_specs,
        out_specs=(out_spec, out_spec, out_spec),
        compiler_params=pltpu.CompilerParams(
            dimension_semantics=("parallel", "parallel"),
            vmem_limit_bytes=_vmem_limit_bytes(proj_est)),
    )(*proj_inputs)

    q = q.reshape(B, S, D)
    k = k.reshape(B, S, D)
    v = v.reshape(B, S, D)

    # ---- flash attention + fused output projection --------------------------
    tq = _pick_tile(S, (256, 128))
    tk = _pick_tile(S, (256, 128))
    nq, nk = S // tq, S // tk

    if kv_resident is None:
        # Keep the whole K/V sequence resident per batch when it fits a
        # conservative budget (v7x-safe alongside Wo): avoids re-DMAing all of
        # K/V for every q tile (biggest win on v5e HBM bandwidth).
        kv_resident = (2 * S * D * 2) <= (8 << 20)

    if kv_resident:
        kv_spec = pl.BlockSpec((None, S, D), lambda b, qi, ki: (b, 0, 0))
        kv_block_bytes = S * D * 2
    else:
        kv_spec = pl.BlockSpec((None, tk, D), lambda b, qi, ki: (b, ki, 0))
        kv_block_bytes = tk * D * 2

    out_bytes = jnp.dtype(out_dtype).itemsize
    attn_est = (tq * D * 2 * 2                    # q block (double-buffered)
                + 2 * kv_block_bytes * 2          # k + v
                + D * D * 2 * 2                   # Wo
                + 8 * D * 4 * 2                   # bo (sublane-padded)
                + tq * D * out_bytes * 2          # output block
                + 2 * n_heads * tq * 128 * 4      # m, l scratch (lane-padded)
                + tq * D * 4)                     # acc scratch

    kernel = functools.partial(_flash_attn_kernel, n_heads=n_heads,
                               head_dim=head_dim, tk=tk,
                               kv_resident=kv_resident)

    out = pl.pallas_call(
        kernel,
        out_shape=jax.ShapeDtypeStruct((B, S, D), out_dtype),
        grid=(B, nq, nk),
        in_specs=[
            pl.BlockSpec((None, tq, D), lambda b, qi, ki: (b, qi, 0)),
            kv_spec,
            kv_spec,
            pl.BlockSpec((D, D), lambda b, qi, ki: (0, 0)),
            pl.BlockSpec((1, D), lambda b, qi, ki: (0, 0)),
        ],
        out_specs=pl.BlockSpec((None, tq, D), lambda b, qi, ki: (b, qi, 0)),
        scratch_shapes=[
            pltpu.VMEM((n_heads, tq, 1), jnp.float32),   # running max  m
            pltpu.VMEM((n_heads, tq, 1), jnp.float32),   # running sum  l
            pltpu.VMEM((tq, D), jnp.float32),            # un-normalized ctx
        ],
        compiler_params=pltpu.CompilerParams(
            dimension_semantics=("parallel", "parallel", "arbitrary"),
            vmem_limit_bytes=_vmem_limit_bytes(attn_est)),
    )(q, k, v, wo, bo)
    return out


# ------------------------------ reference -------------------------------------

def _reference_mha(query, key, value, params, *, n_heads):
    """Pure-JAX f32 reference matching the PyTorch module semantics."""
    B, S, D = query.shape
    hd = D // n_heads
    q = query @ params['wq_t'] + params['bq']
    k = key @ params['wk_t'] + params['bk']
    v = value @ params['wv_t'] + params['bv']
    q = q.reshape(B, S, n_heads, hd).transpose(0, 2, 1, 3)
    k = k.reshape(B, S, n_heads, hd).transpose(0, 2, 1, 3)
    v = v.reshape(B, S, n_heads, hd).transpose(0, 2, 1, 3)
    scores = jnp.einsum('bhqd,bhkd->bhqk', q, k) / math.sqrt(hd)
    probs = jax.nn.softmax(scores, axis=-1)
    out = jnp.einsum('bhqk,bhkd->bhqd', probs, v)
    out = out.transpose(0, 2, 1, 3).reshape(B, S, D)
    return out @ params['wo_t'] + params['bo']


if __name__ == "__main__":
    # Small shapes consistent with the module's forward.
    B, S, D, H = 2, 8, 32, 4   # batch, seq, model_dim, n_heads

    root = jax.random.PRNGKey(0)
    keys = jax.random.split(root, 12)

    # PyTorch Linear weight is (out, in); we store the transposed (in, out)
    # version used as x @ W_T + b.
    bound = 1.0 / math.sqrt(D)

    def uniform(k, shape):
        return jax.random.uniform(k, shape, jnp.float32, -bound, bound)

    params = {
        'wq_t': uniform(keys[0], (D, D)), 'bq': uniform(keys[1], (D,)),
        'wk_t': uniform(keys[2], (D, D)), 'bk': uniform(keys[3], (D,)),
        'wv_t': uniform(keys[4], (D, D)), 'bv': uniform(keys[5], (D,)),
        'wo_t': uniform(keys[6], (D, D)), 'bo': uniform(keys[7], (D,)),
    }

    query = jax.random.normal(keys[8], (B, S, D), jnp.float32)
    key_in = jax.random.normal(keys[9], (B, S, D), jnp.float32)
    value = jax.random.normal(keys[10], (B, S, D), jnp.float32)

    # 1) Cross-attention (distinct q/k/v): exercises the K/V-resident path.
    out = multi_head_attention(query, key_in, value, params, n_heads=H)
    out = jax.block_until_ready(out)
    ref = _reference_mha(query, key_in, value, params, n_heads=H)
    assert out.shape == (B, S, D)
    # bf16 MXU operands with f32 accumulation -> bf16-level tolerance.
    assert jnp.allclose(out, ref, atol=5e-2, rtol=5e-2), "mismatch (cross)"

    # 2) Self-attention (shared activation -> single projection input DMA) and
    #    the per-kv-tile (non-resident) K/V path.
    out_sa = multi_head_attention(query, query, query, params, n_heads=H,
                                  kv_resident=False)
    out_sa = jax.block_until_ready(out_sa)
    ref_sa = _reference_mha(query, query, query, params, n_heads=H)
    assert jnp.allclose(out_sa, ref_sa, atol=5e-2, rtol=5e-2), "mismatch (self)"

    print("KERNEL_OK")
</pallas_src>

<mosaic_0001>
module attributes {stable_mosaic.version = 11 : i64} {
  func.func @_qkv_proj_kernel(%arg0: i32, %arg1: i32, %arg2: memref<16x32xbf16, #tpu.memory_space<vmem>>, %arg3: memref<16x32xbf16, #tpu.memory_space<vmem>>, %arg4: memref<16x32xbf16, #tpu.memory_space<vmem>>, %arg5: memref<32x32xbf16, #tpu.memory_space<vmem>>, %arg6: memref<1x32xf32, #tpu.memory_space<vmem>>, %arg7: memref<32x32xbf16, #tpu.memory_space<vmem>>, %arg8: memref<1x32xf32, #tpu.memory_space<vmem>>, %arg9: memref<32x32xbf16, #tpu.memory_space<vmem>>, %arg10: memref<1x32xf32, #tpu.memory_space<vmem>>, %arg11: memref<16x32xbf16, #tpu.memory_space<vmem>>, %arg12: memref<16x32xbf16, #tpu.memory_space<vmem>>, %arg13: memref<16x32xbf16, #tpu.memory_space<vmem>>) attributes {dimension_semantics = [#tpu.dimension_semantics<parallel>, #tpu.dimension_semantics<parallel>], iteration_bounds = array<i64: 1, 1>, scalar_prefetch = 0 : i64, scratch_operands = 0 : i64, tpu.core_type = #tpu.core_type<tc>, window_params = [{transform_indices = @transform_0, window_bounds = array<i64: 16, 32>}, {transform_indices = @transform_1, window_bounds = array<i64: 16, 32>}, {transform_indices = @transform_2, window_bounds = array<i64: 16, 32>}, {transform_indices = @transform_3, window_bounds = array<i64: 32, 32>}, {transform_indices = @transform_4, window_bounds = array<i64: 1, 32>}, {transform_indices = @transform_5, window_bounds = array<i64: 32, 32>}, {transform_indices = @transform_6, window_bounds = array<i64: 1, 32>}, {transform_indices = @transform_7, window_bounds = array<i64: 32, 32>}, {transform_indices = @transform_8, window_bounds = array<i64: 1, 32>}, {transform_indices = @transform_9, window_bounds = array<i64: 16, 32>}, {transform_indices = @transform_10, window_bounds = array<i64: 16, 32>}, {transform_indices = @transform_11, window_bounds = array<i64: 16, 32>}]} {
    %c0 = arith.constant 0 : index
    %c0_0 = arith.constant 0 : index
    %0 = vector.load %arg2[%c0, %c0_0] : memref<16x32xbf16, #tpu.memory_space<vmem>>, vector<16x32xbf16>
    %c0_1 = arith.constant 0 : index
    %c0_2 = arith.constant 0 : index
    %1 = vector.load %arg3[%c0_1, %c0_2] : memref<16x32xbf16, #tpu.memory_space<vmem>>, vector<16x32xbf16>
    %c0_3 = arith.constant 0 : index
    %c0_4 = arith.constant 0 : index
    %2 = vector.load %arg4[%c0_3, %c0_4] : memref<16x32xbf16, #tpu.memory_space<vmem>>, vector<16x32xbf16>
    %c0_5 = arith.constant 0 : index
    %c0_6 = arith.constant 0 : index
    %3 = vector.load %arg5[%c0_5, %c0_6] : memref<32x32xbf16, #tpu.memory_space<vmem>>, vector<32x32xbf16>
    %cst = arith.constant dense<0.000000e+00> : vector<16x32xf32>
    %4 = tpu.matmul %0, %3, %cst {dimension_numbers = #tpu.dot_dimension_numbers<[1], [0], [0], [1], [0, 0, 1, 1], [], []>} : vector<16x32xbf16>, vector<32x32xbf16>, vector<16x32xf32> -> vector<16x32xf32>
    %c0_7 = arith.constant 0 : index
    %c0_8 = arith.constant 0 : index
    %5 = vector.load %arg6[%c0_7, %c0_8] : memref<1x32xf32, #tpu.memory_space<vmem>>, vector<1x32xf32>
    %6 = vector.broadcast %5 : vector<1x32xf32> to vector<16x32xf32>
    %7 = arith.addf %4, %6 : vector<16x32xf32>
    %8 = arith.truncf %7 : vector<16x32xf32> to vector<16x32xbf16>
    %c0_9 = arith.constant 0 : index
    %c0_10 = arith.constant 0 : index
    %9 = vector.load %arg11[%c0_9, %c0_10] : memref<16x32xbf16, #tpu.memory_space<vmem>>, vector<16x32xbf16>
    tpu.vector_store %arg11[%c0_9, %c0_10], %8 {strides = array<i32>} : memref<16x32xbf16, #tpu.memory_space<vmem>>, vector<16x32xbf16>,
    %c0_11 = arith.constant 0 : index
    %c0_12 = arith.constant 0 : index
    %10 = vector.load %arg7[%c0_11, %c0_12] : memref<32x32xbf16, #tpu.memory_space<vmem>>, vector<32x32xbf16>
    %cst_13 = arith.constant dense<0.000000e+00> : vector<16x32xf32>
    %11 = tpu.matmul %1, %10, %cst_13 {dimension_numbers = #tpu.dot_dimension_numbers<[1], [0], [0], [1], [0, 0, 1, 1], [], []>} : vector<16x32xbf16>, vector<32x32xbf16>, vector<16x32xf32> -> vector<16x32xf32>
    %c0_14 = arith.constant 0 : index
    %c0_15 = arith.constant 0 : index
    %12 = vector.load %arg8[%c0_14, %c0_15] : memref<1x32xf32, #tpu.memory_space<vmem>>, vector<1x32xf32>
    %13 = vector.broadcast %12 : vector<1x32xf32> to vector<16x32xf32>
    %14 = arith.addf %11, %13 : vector<16x32xf32>
    %15 = arith.truncf %14 : vector<16x32xf32> to vector<16x32xbf16>
    %c0_16 = arith.constant 0 : index
    %c0_17 = arith.constant 0 : index
    %16 = vector.load %arg12[%c0_16, %c0_17] : memref<16x32xbf16, #tpu.memory_space<vmem>>, vector<16x32xbf16>
    tpu.vector_store %arg12[%c0_16, %c0_17], %15 {strides = array<i32>} : memref<16x32xbf16, #tpu.memory_space<vmem>>, vector<16x32xbf16>,
    %c0_18 = arith.constant 0 : index
    %c0_19 = arith.constant 0 : index
    %17 = vector.load %arg9[%c0_18, %c0_19] : memref<32x32xbf16, #tpu.memory_space<vmem>>, vector<32x32xbf16>
    %cst_20 = arith.constant dense<0.000000e+00> : vector<16x32xf32>
    %18 = tpu.matmul %2, %17, %cst_20 {dimension_numbers = #tpu.dot_dimension_numbers<[1], [0], [0], [1], [0, 0, 1, 1], [], []>} : vector<16x32xbf16>, vector<32x32xbf16>, vector<16x32xf32> -> vector<16x32xf32>
    %c0_21 = arith.constant 0 : index
    %c0_22 = arith.constant 0 : index
    %19 = vector.load %arg10[%c0_21, %c0_22] : memref<1x32xf32, #tpu.memory_space<vmem>>, vector<1x32xf32>
    %20 = vector.broadcast %19 : vector<1x32xf32> to vector<16x32xf32>
    %21 = arith.addf %18, %20 : vector<16x32xf32>
    %22 = arith.truncf %21 : vector<16x32xf32> to vector<16x32xbf16>
    %c0_23 = arith.constant 0 : index
    %c0_24 = arith.constant 0 : index
    %23 = vector.load %arg13[%c0_23, %c0_24] : memref<16x32xbf16, #tpu.memory_space<vmem>>, vector<16x32xbf16>
    tpu.vector_store %arg13[%c0_23, %c0_24], %22 {strides = array<i32>} : memref<16x32xbf16, #tpu.memory_space<vmem>>, vector<16x32xbf16>,
    return
  }
  func.func @transform_0(%arg0: i32, %arg1: i32) -> (i32, i32) {
    %c0_i32 = arith.constant 0 : i32
    %c0_i32_0 = arith.constant 0 : i32
    return %arg0, %c0_i32 : i32, i32
  }
  func.func @transform_1(%arg0: i32, %arg1: i32) -> (i32, i32) {
    %c0_i32 = arith.constant 0 : i32
    %c0_i32_0 = arith.constant 0 : i32
    return %arg0, %c0_i32 : i32, i32
  }
  func.func @transform_2(%arg0: i32, %arg1: i32) -> (i32, i32) {
    %c0_i32 = arith.constant 0 : i32
    %c0_i32_0 = arith.constant 0 : i32
    return %arg0, %c0_i32 : i32, i32
  }
  func.func @transform_3(%arg0: i32, %arg1: i32) -> (i32, i32) {
    %c0_i32 = arith.constant 0 : i32
    %c0_i32_0 = arith.constant 0 : i32
    return %c0_i32, %arg1 : i32, i32
  }
  func.func @transform_4(%arg0: i32, %arg1: i32) -> (i32, i32) {
    %c0_i32 = arith.constant 0 : i32
    %c0_i32_0 = arith.constant 0 : i32
    return %c0_i32, %arg1 : i32, i32
  }
  func.func @transform_5(%arg0: i32, %arg1: i32) -> (i32, i32) {
    %c0_i32 = arith.constant 0 : i32
    %c0_i32_0 = arith.constant 0 : i32
    return %c0_i32, %arg1 : i32, i32
  }
  func.func @transform_6(%arg0: i32, %arg1: i32) -> (i32, i32) {
    %c0_i32 = arith.constant 0 : i32
    %c0_i32_0 = arith.constant 0 : i32
    return %c0_i32, %arg1 : i32, i32
  }
  func.func @transform_7(%arg0: i32, %arg1: i32) -> (i32, i32) {
    %c0_i32 = arith.constant 0 : i32
    %c0_i32_0 = arith.constant 0 : i32
    return %c0_i32, %arg1 : i32, i32
  }
  func.func @transform_8(%arg0: i32, %arg1: i32) -> (i32, i32) {
    %c0_i32 = arith.constant 0 : i32
    %c0_i32_0 = arith.constant 0 : i32
    return %c0_i32, %arg1 : i32, i32
  }
  func.func @transform_9(%arg0: i32, %arg1: i32) -> (i32, i32) {
    %c0_i32 = arith.constant 0 : i32
    return %arg0, %arg1 : i32, i32
  }
  func.func @transform_10(%arg0: i32, %arg1: i32) -> (i32, i32) {
    %c0_i32 = arith.constant 0 : i32
    return %arg0, %arg1 : i32, i32
  }
  func.func @transform_11(%arg0: i32, %arg1: i32) -> (i32, i32) {
    %c0_i32 = arith.constant 0 : i32
    return %arg0, %arg1 : i32, i32
  }
}

</mosaic_0001>

<bundles_post_ra>
// kernel: tpu_custom_call.1
= control target key start
LH: loop header
LB: loop body
LE: loop exit
PB: predicated region body
PF: predicated region fallthrough
CT: control target
= control target key end

     0   :  { %17 = vsyncpa [#allocation3], 0  ;;  %s765_s0 = inlined_call_operand.hbm [shape: bf16[16,32], index: 0, kind: input, shape index: {}]   ;;  %s766_s1 = inlined_call_operand.hbm [shape: bf16[16,32], index: 1, kind: input, shape index: {}]   ;;  %s767_s2 = inlined_call_operand.hbm [shape: bf16[16,32], index: 2, kind: input, shape index: {}]   ;;  %s768_s3 = inlined_call_operand.hbm [shape: bf16[32,32], index: 3, kind: input, shape index: {}]   ;;  %s769_s4 = inlined_call_operand.vmem [shape: f32[1,32], index: 4, kind: input, shape index: {}]   ;;  %s770_s5 = inlined_call_operand.hbm [shape: bf16[32,32], index: 5, kind: input, shape index: {}]   ;;  %s771_s6 = inlined_call_operand.vmem [shape: f32[1,32], index: 6, kind: input, shape index: {}]   ;;  %s772_s7 = inlined_call_operand.hbm [shape: bf16[32,32], index: 7, kind: input, shape index: {}]   ;;  %s773_s8 = inlined_call_operand.vmem [shape: f32[1,32], index: 8, kind: input, shape index: {}]   ;;  %s774_s9 = inlined_call_operand.hbm [shape: bf16[16,32], index: 9, kind: output, shape index: {0}]   ;;  %s775_s10 = inlined_call_operand.hbm [shape: bf16[16,32], index: 10, kind: output, shape index: {1}]   ;;  %s776_s11 = inlined_call_operand.hbm [shape: bf16[16,32], index: 11, kind: output, shape index: {2}]  }
   0x1   :  { %18 = vsyncpa [#allocation6], 0 }
   0x2   :  { %19 = vsyncpa [#allocation9], 0 }
   0x3   :  { %20 = vsyncpa [#allocation12], 0 }
   0x4   :  { %21 = vsyncpa [#allocation4], 0 }
   0x5   :  { %22 = vsyncpa [#allocation15], 0  ;;  %s40_s19 = sshll.u32 %s766_s1, 4  ;;  %s625_s20 = smov [#allocation5]   ;;  %s41_s19 = int_to_ptr.hbm [resolvable:$true] %s40_s19 }
   0x6   :  { %s42_s21 = sshll.u32 %s625_s20, 4  ;;  %s66_s24 = sshll.u32 %s768_s3, 4  ;;  %s43_s21 = int_to_ptr.vmem [resolvable:$true] %s42_s21  ;;  %s67_s24 = int_to_ptr.hbm [resolvable:$true] %s66_s24 }
   0x7   :  { %s626_s25 = smov 64   ;;  %s627_s26 = smov 4  }
   0x8   :  { %48 = dma.hbm_to_vmem [thread:$0]  %s41_s19, 128, %s43_s21, [#allocation6], %s626_s25, %s626_s25, %s627_s26  }
   0x9   :  { %s628_s27 = smov [#allocation8]   ;;  %s27_s1 = sshll.u32 %s765_s0, 4  ;;  %s28_s1 = int_to_ptr.hbm [resolvable:$true] %s27_s1 }
   0xa   :  { %s68_s28 = sshll.u32 %s628_s27, 4  ;;  %s53_s13 = sshll.u32 %s767_s2, 4  ;;  %s69_s28 = int_to_ptr.vmem [resolvable:$true] %s68_s28  ;;  %s54_s13 = int_to_ptr.hbm [resolvable:$true] %s53_s13 }
   0xb   :  { %74 = dma.hbm_to_vmem [thread:$0]  %s67_s24, 256, %s69_s28, [#allocation9], %s626_s25, %s626_s25, %s627_s26  }
   0xc   :  { %s629_s14 = smov [#allocation2]   ;;  %s630_s16 = smov [#allocation7]  }
   0xd   :  { %s29_s15 = sshll.u32 %s629_s14, 4  ;;  %s55_s0 = sshll.u32 %s630_s16, 4  ;;  %s30_s15 = int_to_ptr.vmem [resolvable:$true] %s29_s15  ;;  %s56_s0 = int_to_ptr.vmem [resolvable:$true] %s55_s0 }
   0xe   :  { %35 = dma.hbm_to_vmem [thread:$0]  %s28_s1, 128, %s30_s15, [#allocation3], %s626_s25, %s626_s25, %s627_s26  }
   0xf   :  { %s81_s19 = sshll.u32 %s770_s5, 4  ;;  %s96_s21 = sshll.u32 %s772_s7, 4  ;;  %s82_s19 = int_to_ptr.hbm [resolvable:$true] %s81_s19  ;;  %s97_s21 = int_to_ptr.hbm [resolvable:$true] %s96_s21 }
  0x10   :  { %61 = dma.hbm_to_vmem [thread:$0]  %s54_s13, 128, %s56_s0, [#allocation6], %s626_s25, %s626_s25, %s627_s26  }
  0x11   :  { %s631_s22 = smov [#allocation10]   ;;  %s632_s24 = smov [#allocation11]  }
  0x12   :  { %s83_s23 = sshll.u32 %s631_s22, 4  ;;  %s98_s5 = sshll.u32 %s632_s24, 4  ;;  %s84_s23 = int_to_ptr.vmem [resolvable:$true] %s83_s23  ;;  %s99_s5 = int_to_ptr.vmem [resolvable:$true] %s98_s5 }
  0x13   :  { %89 = dma.hbm_to_vmem [thread:$0]  %s82_s19, 256, %s84_s23, [#allocation9], %s626_s25, %s626_s25, %s627_s26  }
  0x14   :  { %104 = dma.hbm_to_vmem [thread:$0]  %s97_s21, 256, %s99_s5, [#allocation12], %s626_s25, %s626_s25, %s627_s26  }
  0x15   :  { %613 = dma.done.wait [#allocation3], 128  }
  0x16   :  { %614 = vsyncadd [#allocation3], 4294967168 }
  0x17   :  { %615 = dma.done.wait [#allocation6], 256  }
  0x18   :  { %616 = vsyncadd [#allocation6], 4294967040 }
  0x19   :  { %617 = dma.done.wait [#allocation9], 512  }
  0x1a   :  { %618 = vsyncadd [#allocation9], 4294966784 }
  0x1b   :  { %619 = dma.done.wait [#allocation12], 256  }
  0x1c   :  { %620 = vsyncadd [#allocation12], 4294967040  ;;  %v378_v0 = vld [vmem:[#allocation8 + $0x8] sm:$0xff]  ;;  %v380_v1 = vld [vmem:[#allocation10 + $0x8] sm:$0xff]  ;;  %vm163_vm0 = vcmask 261120   ;;  %vm183_vm1 = vcmask 257024  }
  0x1d   :  { %v382_v2 = vld [vmem:[#allocation11 + $0x8] sm:$0xff]  ;;  %173 = vmatpush.bf16.msra.mxu0 %v378_v0  ;;  %220 = vmatpush.bf16.msra.mxu1 %v380_v1  ;;  %v377_v3 = vld [vmem:[#allocation8] sm:$0xff]  ;;  %v379_v4 = vld [vmem:[#allocation10] sm:$0xff]  ;;  %s284_s13 = sshll.u32 %s774_s9, 4  ;;  %s634_s14 = smov [#allocation14]   ;;  %s285_s13 = int_to_ptr.hbm [resolvable:$true] %s284_s13 }
  0x1e   :  { %266 = vmatpush.bf16.msra.mxu2 %v382_v2  ;;  %v381_v5 = vld [vmem:[#allocation11] sm:$0xff]  ;;  %v374_v6 = vld [vmem:[#allocation2] sm:$0xff]  ;;  %v375_v7 = vld [vmem:[#allocation5] sm:$0xff]  ;;  %s295_s15 = sshll.u32 %s634_s14, 4  ;;  %s297_s0 = sshll.u32 %s775_s10, 4  ;;  %s296_s15 = int_to_ptr.vmem [resolvable:$true] %s295_s15  ;;  %s298_s0 = int_to_ptr.hbm [resolvable:$true] %s297_s0 }
  0x1f   :  { %v376_v8 = vld [vmem:[#allocation7] sm:$0xff]  ;;  %v394_v9 = vld [vmem:[%s769_s4] ss:$0 sm:$0xff]  ;;  %s633_s4 = smov [#allocation13]   ;;  %s635_s9 = smov [#allocation16]  }
  0x20   :  { %v395_v10 = vld [vmem:[%s771_s6] ss:$0 sm:$0xff]  ;;  %s282_s6 = sshll.u32 %s633_s4, 4  ;;  %s308_s17 = sshll.u32 %s635_s9, 4  ;;  %s283_s6 = int_to_ptr.vmem [resolvable:$true] %s282_s6  ;;  %s309_s17 = int_to_ptr.vmem [resolvable:$true] %s308_s17 }
  0x21   :  { %174 = vmatpush.bf16.msra.mxu0 %v377_v3  ;;  %221 = vmatpush.bf16.msra.mxu1 %v379_v4  ;;  %v396_v17 = vld [vmem:[%s773_s8] ss:$0 sm:$0xff]  ;;  %s310_s2 = sshll.u32 %s776_s11, 4  ;;  %s311_s2 = int_to_ptr.hbm [resolvable:$true] %s310_s2 }
  0x22   :  { %267 = vmatpush.bf16.msra.mxu2 %v381_v5 }
  0x24   :  { %347 = vmatmul.msk.bf16.vlgmr.msra.gmra.mxu0 %vm163_vm0, %v374_v6  ;;  %360 = vmatmul.msk.bf16.vlgmr.msra.gmra.mxu1 %vm163_vm0, %v375_v7 }
  0x25   :  { %373 = vmatmul.msk.bf16.vlgmr.msra.gmra.mxu2 %vm163_vm0, %v376_v8 }
  0xa1   :  { %v176_v11 = vpop.f32.mrf.mxu0  ;;  %v223_v12 = vpop.f32.mrf.mxu1 }
  0xa2   :  { %v177_v13 = vadd.f32 %v394_v9, %v176_v11  ;;  %v224_v14 = vadd.f32 %v395_v10, %v223_v12 }
  0xa4   :  { %v181_v15 = vpack.c.bf16 %v177_v13, %v177_v13  ;;  %v228_v16 = vpack.c.bf16 %v224_v14, %v224_v14 }
  0xa6   :  { %184 = vst.msk [vmem:[#allocation13] sm:$0xf] %vm183_vm1, %v181_v15 }
  0xa7   :  { %230 = vst.msk [vmem:[#allocation14] sm:$0xf] %vm183_vm1, %v228_v16 }
  0xa8   :  { %v269_v18 = vpop.f32.mrf.mxu2 }
  0xa9   :  { %v270_v19 = vadd.f32 %v396_v17, %v269_v18  ;;  %v178_v20 = vpop.f32.mrf.mxu0  ;;  %v225_v21 = vpop.f32.mrf.mxu1 }
  0xaa   :  { %v179_v22 = vadd.f32 %v394_v9, %v178_v20  ;;  %v226_v23 = vadd.f32 %v395_v10, %v225_v21 }
  0xab   :  { %v274_v24 = vpack.c.bf16 %v270_v19, %v270_v19 }
  0xac   :  { %v182_v25 = vpack.c.bf16 %v179_v22, %v179_v22  ;;  %v229_v26 = vpack.c.bf16 %v226_v23, %v226_v23 }
  0xad   :  { %276 = vst.msk [vmem:[#allocation16] sm:$0xf] %vm183_vm1, %v274_v24 }
  0xae   :  { %185 = vst.msk [vmem:[#allocation13 + $0x4] sm:$0xf] %vm183_vm1, %v182_v25 }
  0xaf   :  { %231 = vst.msk [vmem:[#allocation14 + $0x4] sm:$0xf] %vm183_vm1, %v229_v26  ;;  %290 = dma.vmem_to_hbm [thread:$0]  %s283_s6, 128, %s285_s13, [#allocation4], %s626_s25, %s626_s25, %s627_s26  }
  0xb0   :  { %v271_v27 = vpop.f32.mrf.mxu2  ;;  %303 = dma.vmem_to_hbm [thread:$0]  %s296_s15, 128, %s298_s0, [#allocation15], %s626_s25, %s626_s25, %s627_s26  }
  0xb1   :  { %v272_v28 = vadd.f32 %v396_v17, %v271_v27 }
  0xb3   :  { %v275_v29 = vpack.c.bf16 %v272_v28, %v272_v28 }
  0xb5   :  { %277 = vst.msk [vmem:[#allocation16 + $0x4] sm:$0xf] %vm183_vm1, %v275_v29 }
  0xb6   :  { %316 = dma.vmem_to_hbm [thread:$0]  %s309_s17, 128, %s311_s2, [#allocation15], %s626_s25, %s626_s25, %s627_s26  }
  0xb7   :  { %621 = dma.done.wait [#allocation4], 128  }
  0xb8   :  { %622 = vsyncadd [#allocation4], 4294967168 }
  0xb9   :  { %623 = dma.done.wait [#allocation15], 256  }
  0xba   :  { %624 = vsyncadd [#allocation15], 4294967040 }
  0xbb   :  { %329 = vsyncpa [#allocation3], 1 }
  0xbc   :  { %330 = vsyncpa [#allocation6], 1 }
  0xbd   :  { %331 = vsyncpa [#allocation9], 1 }
  0xbe   :  { %332 = vsyncpa [#allocation12], 1 }
  0xbf   :  { %333 = vsyncpa [#allocation4], 1 }
  0xc0   :  { %334 = vsyncpa [#allocation15], 1 }

</bundles_post_ra>
